<compile_context>
chip_gen: v7x
topology: tpu7x:2x2x1
jax: 0.10.0
libtpu: 0.0.40
codegen_flags: <defaults>
</compile_context>

<pallas_src>
import jax
import jax.numpy as jnp
from jax.experimental import pallas as pl
from jax.experimental.pallas import tpu as pltpu


def _mse_kernel(scal_ref, p_ref, t_ref, o_ref, acc_ref):
    """Sequential reduction over the batch grid axis.

    scal_ref : SMEM f32[2]         -> [weight, 1/N]   (read only in finalize)
    p_ref    : VMEM [H, W]         channel-0 prediction tile (batch b)
    t_ref    : VMEM [H, W]         target tile (batch b)
    o_ref    : SMEM f32[1, 1]      scalar loss output
    acc_ref  : VMEM f32[H, W]      running elementwise sum of squared errors
    """
    b = pl.program_id(0)

    @pl.when(b == 0)
    def _init():
        acc_ref[...] = jnp.zeros_like(acc_ref)
        o_ref[0, 0] = 0.0

    d = p_ref[...].astype(jnp.float32) - t_ref[...].astype(jnp.float32)
    acc_ref[...] += d * d

    @pl.when(b == pl.num_programs(0) - 1)
    def _finalize():
        # mean(weights * (p - t)^2) with scalar weights == weight * sum / N
        o_ref[0, 0] = jnp.sum(acc_ref[...]) * scal_ref[0] * scal_ref[1]


def train_loss(preds, labels, weights=1.0):
    """Pallas equivalent of TrainLoss(num_outputs, 'MSE').forward(preds, labels, weights)."""
    B, C, H, W = preds.shape
    assert labels.shape == (B, H, W), (preds.shape, labels.shape)
    n = B * H * W

    # [weight, 1/N] scalars, kept off the per-step critical path (finalize-only reads).
    w = jnp.asarray(weights, dtype=jnp.float32).reshape((1,))
    scal = jnp.concatenate([w, jnp.full((1,), 1.0 / n, dtype=jnp.float32)])

    out = pl.pallas_call(
        _mse_kernel,
        out_shape=jax.ShapeDtypeStruct((1, 1), jnp.float32),
        grid_spec=pltpu.PrefetchScalarGridSpec(
            num_scalar_prefetch=0,
            grid=(B,),
            in_specs=[
                pl.BlockSpec(memory_space=pltpu.SMEM),                    # [weight, 1/N]
                # channel-0 selection happens here: only preds[:, 0] is DMA'd
                pl.BlockSpec((None, None, H, W), lambda b: (b, 0, 0, 0)),  # pred tile
                pl.BlockSpec((None, H, W), lambda b: (b, 0, 0)),           # target tile
            ],
            out_specs=pl.BlockSpec(memory_space=pltpu.SMEM),              # scalar loss
            scratch_shapes=[pltpu.VMEM((H, W), jnp.float32)],             # vector accumulator
        ),
        compiler_params=pltpu.CompilerParams(
            dimension_semantics=("arbitrary",),                           # reduction axis
        ),
    )(scal, preds, labels)
    return out[0, 0]


if __name__ == "__main__":
    key = jax.random.PRNGKey(0)
    k1, k2 = jax.random.split(key)

    B, C, H, W = 2, 4, 16, 16               # num_outputs = C = 4
    preds = jax.random.normal(k1, (B, C, H, W), dtype=jnp.float32)
    labels = jax.random.normal(k2, (B, H, W), dtype=jnp.float32)
    weights = 1.0

    loss = jax.block_until_ready(train_loss(preds, labels, weights))

    # pure-JAX reference (mirrors the PyTorch forward)
    ref = jnp.mean(weights * (preds[:, 0] - labels) ** 2)
    assert jnp.allclose(loss, ref, rtol=1e-6, atol=1e-6), (loss, ref)

    print("KERNEL_OK")
</pallas_src>

<mosaic_0001>
module attributes {stable_mosaic.version = 11 : i64} {
  func.func @_mse_kernel(%arg0: i32, %arg1: memref<2xf32, #tpu.memory_space<smem>>, %arg2: memref<1x1x16x16xf32, #tpu.memory_space<vmem>>, %arg3: memref<1x16x16xf32, #tpu.memory_space<vmem>>, %arg4: memref<1x1xf32, #tpu.memory_space<smem>>, %arg5: memref<16x16xf32, #tpu.memory_space<vmem>>) attributes {dimension_semantics = [#tpu.dimension_semantics<arbitrary>], iteration_bounds = array<i64: 2>, scalar_prefetch = 0 : i64, scratch_operands = 1 : i64, tpu.core_type = #tpu.core_type<tc>, window_params = [{transform_indices = @transform_0, window_bounds = array<i64: 2>}, {transform_indices = @transform_1, window_bounds = array<i64: 1, 1, 16, 16>}, {transform_indices = @transform_2, window_bounds = array<i64: 1, 16, 16>}, {transform_indices = @transform_3, window_bounds = array<i64: 1, 1>}]} {
    %c0_i32 = arith.constant 0 : i32
    %0 = arith.cmpi eq, %arg0, %c0_i32 : i32
    %1 = arith.extui %0 : i1 to i32
    %c0_i32_0 = arith.constant 0 : i32
    %2 = arith.cmpi ne, %1, %c0_i32_0 : i32
    scf.if %2 {
      %cst = arith.constant 0.000000e+00 : f32
      %15 = vector.broadcast %cst : f32 to vector<16x16xf32>
      %c0_12 = arith.constant 0 : index
      %c0_13 = arith.constant 0 : index
      %16 = vector.load %arg5[%c0_12, %c0_13] : memref<16x16xf32, #tpu.memory_space<vmem>>, vector<16x16xf32>
      tpu.vector_store %arg5[%c0_12, %c0_13], %15 {strides = array<i32>} : memref<16x16xf32, #tpu.memory_space<vmem>>, vector<16x16xf32>,
      %cst_14 = arith.constant 0.000000e+00 : f32
      %c0_15 = arith.constant 0 : index
      %c0_16 = arith.constant 0 : index
      %17 = memref.load %arg4[%c0_15, %c0_16] : memref<1x1xf32, #tpu.memory_space<smem>>
      memref.store %cst_14, %arg4[%c0_15, %c0_16] : memref<1x1xf32, #tpu.memory_space<smem>>
    } else {
    }
    %c0 = arith.constant 0 : index
    %c0_1 = arith.constant 0 : index
    %c0_2 = arith.constant 0 : index
    %c0_3 = arith.constant 0 : index
    %3 = vector.load %arg2[%c0, %c0_1, %c0_2, %c0_3] : memref<1x1x16x16xf32, #tpu.memory_space<vmem>>, vector<1x1x16x16xf32>
    %4 = vector.shape_cast %3 : vector<1x1x16x16xf32> to vector<16x16xf32>
    %c0_4 = arith.constant 0 : index
    %c0_5 = arith.constant 0 : index
    %c0_6 = arith.constant 0 : index
    %5 = vector.load %arg3[%c0_4, %c0_5, %c0_6] : memref<1x16x16xf32, #tpu.memory_space<vmem>>, vector<1x16x16xf32>
    %6 = vector.shape_cast %5 : vector<1x16x16xf32> to vector<16x16xf32>
    %7 = arith.subf %4, %6 : vector<16x16xf32>
    %c0_7 = arith.constant 0 : index
    %c0_8 = arith.constant 0 : index
    %8 = vector.load %arg5[%c0_7, %c0_8] : memref<16x16xf32, #tpu.memory_space<vmem>>, vector<16x16xf32>
    %9 = arith.mulf %7, %7 : vector<16x16xf32>
    %10 = arith.addf %8, %9 : vector<16x16xf32>
    %c0_9 = arith.constant 0 : index
    %c0_10 = arith.constant 0 : index
    %11 = vector.load %arg5[%c0_9, %c0_10] : memref<16x16xf32, #tpu.memory_space<vmem>>, vector<16x16xf32>
    tpu.vector_store %arg5[%c0_9, %c0_10], %10 {strides = array<i32>} : memref<16x16xf32, #tpu.memory_space<vmem>>, vector<16x16xf32>,
    %c1_i32 = arith.constant 1 : i32
    %12 = arith.cmpi eq, %arg0, %c1_i32 : i32
    %13 = arith.extui %12 : i1 to i32
    %c0_i32_11 = arith.constant 0 : i32
    %14 = arith.cmpi ne, %13, %c0_i32_11 : i32
    scf.if %14 {
      %c0_12 = arith.constant 0 : index
      %c0_13 = arith.constant 0 : index
      %15 = vector.load %arg5[%c0_12, %c0_13] : memref<16x16xf32, #tpu.memory_space<vmem>>, vector<16x16xf32>
      %16 = vector.shape_cast %15 : vector<16x16xf32> to vector<1x16x16xf32>
      %cst = arith.constant dense<0.000000e+00> : vector<1xf32>
      %17 = vector.multi_reduction <add>, %16, %cst [1, 2] : vector<1x16x16xf32> to vector<1xf32>
      %18 = vector.shape_cast %17 : vector<1xf32> to vector<1x1x1xf32>
      %19 = vector.extract %18[0, 0, 0] : f32 from vector<1x1x1xf32>
      %c0_14 = arith.constant 0 : index
      %20 = memref.load %arg1[%c0_14] : memref<2xf32, #tpu.memory_space<smem>>
      %21 = arith.mulf %19, %20 : f32
      %c1 = arith.constant 1 : index
      %22 = memref.load %arg1[%c1] : memref<2xf32, #tpu.memory_space<smem>>
      %23 = arith.mulf %21, %22 : f32
      %c0_15 = arith.constant 0 : index
      %c0_16 = arith.constant 0 : index
      %24 = memref.load %arg4[%c0_15, %c0_16] : memref<1x1xf32, #tpu.memory_space<smem>>
      memref.store %23, %arg4[%c0_15, %c0_16] : memref<1x1xf32, #tpu.memory_space<smem>>
    } else {
    }
    return
  }
  func.func @transform_0(%arg0: i32) -> i32 {
    %c0_i32 = arith.constant 0 : i32
    %c0_i32_0 = arith.constant 0 : i32
    return %c0_i32 : i32
  }
  func.func @transform_1(%arg0: i32) -> (i32, i32, i32, i32) {
    %c0_i32 = arith.constant 0 : i32
    %c0_i32_0 = arith.constant 0 : i32
    %c0_i32_1 = arith.constant 0 : i32
    %c0_i32_2 = arith.constant 0 : i32
    return %arg0, %c0_i32, %c0_i32_0, %c0_i32_1 : i32, i32, i32, i32
  }
  func.func @transform_2(%arg0: i32) -> (i32, i32, i32) {
    %c0_i32 = arith.constant 0 : i32
    %c0_i32_0 = arith.constant 0 : i32
    %c0_i32_1 = arith.constant 0 : i32
    return %arg0, %c0_i32, %c0_i32_0 : i32, i32, i32
  }
  func.func @transform_3(%arg0: i32) -> (i32, i32) {
    %c0_i32 = arith.constant 0 : i32
    %c0_i32_0 = arith.constant 0 : i32
    %c0_i32_1 = arith.constant 0 : i32
    return %c0_i32, %c0_i32_0 : i32, i32
  }
}

</mosaic_0001>

<bundles_post_ra>
// kernel: tpu_custom_call.1
= control target key start
LH: loop header
LB: loop body
LE: loop exit
PB: predicated region body
PF: predicated region fallthrough
CT: control target
= control target key end

     0   :  { %8 = vsyncpa [#allocation5], 0  ;;  %s817_s0 = inlined_call_operand.hbm [shape: f32[2], index: 0, kind: input, shape index: {}]   ;;  %s818_s1 = inlined_call_operand.hbm [shape: f32[2,4,16,16], index: 1, kind: input, shape index: {}]   ;;  %s819_s2 = inlined_call_operand.hbm [shape: f32[2,16,16], index: 2, kind: input, shape index: {}]   ;;  %s820_s3 = inlined_call_operand.hbm [shape: f32[1,1], index: 3, kind: output, shape index: {}]  }
   0x1   :  { %9 = vsyncpa [#allocation4], 0 }
   0x2   :  { %11 = vsyncpa [#allocation4 + $0x1], 0 }
   0x3   :  { %12 = vsyncpa [#allocation9], 0 }
   0x4   :  { %14 = vsyncpa [#allocation9 + $0x1], 0 }
   0x5   :  { %15 = vsyncpa [#allocation6], 0  ;;  %s620_s12 = smov 0   ;;  %s622_s13 = smov 0  }
   0x6   :  { %s624_s14 = smov 0   ;;  %s626_s15 = smov 0  }
   0x7 LB: > { %s639_s16 = sadd.s32 4294967295, %s590_s15   ;;  %s642_s17 = sadd.s32 1, %s590_s15   ;;  %s590_s15 = sphi %s626_s15, %s833_s15   ;;  %s586_s14 = sphi %s624_s14, %s832_s14   ;;  %s582_s13 = sphi %s622_s13, %s831_s13   ;;  %s578_s12 = sphi %s620_s12, %s830_s12  }
   0x8   : > { %s46_s18 = ssub.s32 %s590_s15, %s642_s17  ;;  %s49_s19 = sadd.s32 1, %s586_s14 }
   0x9   : > { %p47_p0 = scmp.eq.s32.totalorder %s46_s18, 0  ;;  %p56_p1 = scmp.ne.s32.totalorder %s586_s14, %s582_s13 }
   0xa   : > { %p57_p2 = scmp.eq.s32.totalorder %s590_s15, 0  ;;  %p62_p3 = scmp.ne.s32.totalorder %s582_s13, %s578_s12 }
   0xb   : > { %s652_s20 = scalar_select %p47_p0, %s586_s14, %s49_s19  }
   0xc   : > { %p58_p4 = por %p57_p2, %p56_p1  ;;  %p821_p5 = scmp.eq.s32.totalorder %s639_s16, 0 }
   0xd   : > { %p369_p6 = scmp.ge.s32.totalorder %s590_s15, 1  ;;  %p120_p7 = scmp.lt.s32.totalorder %s590_s15, 3 }
   0xe   : > { %p659_p8 = por %p821_p5, %p62_p3  ;;  %p417_p11 = scmp.lt.s32.totalorder %s590_s15, 2 }
   0xf   : > { %p664_p10 = pnand %p369_p6, %p120_p7  ;;  %s672_s23 = sand.u32 1, %s586_s14  }
  0x10   : > { %s823_s21 = scalar_select %p659_p8, 1, 0 }
  0x11   : > { %p405_p12 = pneg %p664_p10  ;;  %p674_p13 = pnand %p417_p11, %p58_p4 }
  0x12   : > { %s372_s25 = sshll.u32 %s672_s23, 4  ;;  %s389_s26 = sshll.u32 %s590_s15, 10 }
  0x13   : > { %p406_p0 = pnand %p405_p12, %p821_p5  ;;  %s459_s29 = scalar_lea.hbm %s817_s0, 16 }
  0x14   : > { %p460_p1 = scmp.ne.s32.totalorder %s817_s0, %s459_s29  ;;  %p466_p4 = scmp.lt.u32.totalorder %s459_s29, %s817_s0 }
  0x15   : > { %p461_p2 = pneg %p406_p0 }
  0x17   : > { %p462_p3 = pnand %p461_p2, %p460_p1 }
  0x19   : > { %p463_p6 = pneg %p462_p3 }
  0x1b   : > { %p468_p7 = pnand %p466_p4, %p463_p6 }
  0x1d   : > { %471 = shalt.err (!%p468_p7)
}
  0x1e   : > { %s592_s7 = smov [#allocation3]   ;;  %s697_s12 = scalar_lea.hbm %s818_s1, %s389_s26 }
  0x1f   : > { %408 = dma.hbm_to_smem (!%p406_p0), %s817_s0, 16, %s592_s7, [#allocation5]  }
  0x20   : > { %s146_s18 = scalar_lea.vmem [#allocation7], %s372_s25  ;;  %s143_s27 = scalar_lea.sflag [#allocation4], %s672_s23 }
  0x21   : > { %s153_s19 = sshll.u32 %s146_s18, 4  ;;  %s472_s28 = scalar_lea.hbm %s697_s12, 256  ;;  %s701_s19 = int_to_ptr.vmem [resolvable:$true] %s153_s19 }
  0x22   : > { %p473_p11 = scmp.ne.s32.totalorder %s697_s12, %s472_s28  ;;  %p474_p12 = pneg %p674_p13 }
  0x23   : > { %s477_s30 = scalar_lea.hbm %s818_s1, 2048  ;;  %p478_p2 = scmp.lt.u32.totalorder %s697_s12, %s818_s1 }
  0x24   : > { %p475_p0 = pnand %p474_p12, %p473_p11  ;;  %p479_p3 = scmp.lt.u32.totalorder %s477_s30, %s472_s28 }
  0x25   : > { %p481_p4 = scmp.lt.u32.totalorder %s472_s28, %s697_s12 }
  0x26   : > { %p476_p1 = pneg %p475_p0  ;;  %p480_p6 = por %p479_p3, %p478_p2 }
  0x28   : > { %p482_p7 = por %p481_p4, %p480_p6 }
  0x2a   : > { %p483_p9 = pnand %p482_p7, %p476_p1 }
  0x2c   : > { %486 = shalt.err (!%p483_p9)
}
  0x2d   : > { %s487_s6 = scalar_lea.vmem %s701_s19, 256  ;;  %s593_s7 = smov [#allocation7]  }
  0x2e   : > { %p488_p11 = scmp.ne.s32.totalorder %s701_s19, %s487_s6  ;;  %s492_s8 = sshll.u32 %s593_s7, 4  ;;  %s493_s8 = int_to_ptr.vmem [resolvable:$false] %s492_s8 }
  0x2f   : > { %s494_s9 = scalar_lea.vmem %s493_s8, 512  ;;  %p495_p8 = scmp.lt.s32.totalorder %s701_s19, %s493_s8 }
  0x30   : > { %p490_p0 = pnand %p488_p11, %p474_p12  ;;  %p496_p2 = scmp.lt.s32.totalorder %s494_s9, %s487_s6 }
  0x32   : > { %p491_p5 = pneg %p490_p0  ;;  %p497_p3 = por %p496_p2, %p495_p8 }
  0x34   : > { %p498_p6 = pnand %p497_p3, %p491_p5 }
  0x36   : > { %501 = shalt.err (!%p498_p6)
}
  0x37   : > { %s594_s10 = smov 128   ;;  %s595_s11 = smov 8  }
  0x38   : > { %412 = dma.hbm_to_vmem [thread:$0]  (!%p674_p13), %s697_s12, 256, %s701_s19, %s143_s27, %s594_s10, %s594_s10, %s595_s11  }
  0x39   : > { %s390_s18 = sshll.u32 %s590_s15, 8  ;;  %s167_s30 = scalar_lea.vmem [#allocation8], %s372_s25 }
  0x3a   : > { %s738_s29 = scalar_lea.hbm %s819_s2, %s390_s18  ;;  %s174_s4 = sshll.u32 %s167_s30, 4  ;;  %s742_s4 = int_to_ptr.vmem [resolvable:$true] %s174_s4 }
  0x3b   : > { %s164_s5 = scalar_lea.sflag [#allocation9], %s672_s23  ;;  %s502_s6 = scalar_lea.hbm %s738_s29, 256 }
  0x3c   : > { %p503_p5 = scmp.ne.s32.totalorder %s738_s29, %s502_s6  ;;  %s507_s19 = scalar_lea.hbm %s819_s2, 512 }
  0x3d   : > { %p508_p1 = scmp.lt.u32.totalorder %s738_s29, %s819_s2  ;;  %p509_p4 = scmp.lt.u32.totalorder %s507_s19, %s502_s6 }
  0x3e   : > { %p505_p8 = pnand %p503_p5, %p474_p12  ;;  %p511_p11 = scmp.lt.u32.totalorder %s502_s6, %s738_s29 }
  0x3f   : > { %p510_p7 = por %p509_p4, %p508_p1 }
  0x40   : > { %p506_p9 = pneg %p505_p8 }
  0x41   : > { %p512_p0 = por %p511_p11, %p510_p7 }
  0x43   : > { %p513_p2 = pnand %p512_p0, %p506_p9 }
  0x45   : > { %516 = shalt.err (!%p513_p2)
}
  0x46   : > { %s517_s25 = scalar_lea.vmem %s742_s4, 256  ;;  %s596_s8 = smov [#allocation8]  }
  0x47   : > { %p518_p3 = scmp.ne.s32.totalorder %s742_s4, %s517_s25  ;;  %s522_s9 = sshll.u32 %s596_s8, 4  ;;  %s523_s9 = int_to_ptr.vmem [resolvable:$false] %s522_s9 }
  0x48   : > { %s524_s18 = scalar_lea.vmem %s523_s9, 512  ;;  %p525_p8 = scmp.lt.s32.totalorder %s742_s4, %s523_s9 }
  0x49   : > { %p520_p6 = pnand %p518_p3, %p474_p12  ;;  %p526_p1 = scmp.lt.s32.totalorder %s524_s18, %s517_s25 }
  0x4b   : > { %p521_p5 = pneg %p520_p6  ;;  %p527_p4 = por %p526_p1, %p525_p8 }
  0x4d   : > { %p528_p7 = pnand %p527_p4, %p521_p5 }
  0x4f   : > { %531 = shalt.err (!%p528_p7)
}
  0x50   : > { %415 = dma.hbm_to_vmem [thread:$0]  (!%p674_p13), %s738_s29, 256, %s742_s4, %s164_s5, %s594_s10, %s594_s10, %s595_s11  }
  0x51   : > { %186 = sbr.rel (%p664_p10) target bundleno = 349 (0x15d), region = 32  ;;  %p826_p12 = scmp.eq.s32.totalorder (!%p664_p10), %s639_s16, 0 }
  0x58   : > { %561 = dma.done.wait (%p826_p12), [#allocation5], 16   ;;  %p827_p9 = pmov %p826_p12 }
  0x59   : > { %s192_s24 = sand.u32 1, %s582_s13   ;;  %p828_p11 = scmp.ne.s32.totalorder %s823_s21, 0 }
  0x5a   : > { %563 = vsyncadd (%p827_p9), [#allocation5], 4294967280  ;;  %s380_s28 = sshll.u32 %s192_s24, 4  ;;  %s193_s26 = scalar_lea.sflag [#allocation4], %s192_s24 }
  0x5b   : > { %s196_s30 = scalar_lea.vmem [#allocation7], %s380_s28 }
  0x5c   : > { %565 = dma.done.wait (%p828_p11), %s193_s26, 256  }
  0x5d   : > { %567 = vsyncadd (%p828_p11), %s193_s26, 4294967040  ;;  %s202_s22 = scalar_lea.sflag [#allocation9], %s192_s24  ;;  %s205_s23 = scalar_lea.vmem [#allocation8], %s380_s28 }
  0x5e   : > { %569 = dma.done.wait (%p828_p11), %s202_s22, 256  }
  0x5f   : > { %571 = vsyncadd (%p828_p11), %s202_s22, 4294967040 }
  0x60   : > { %210 = sfence }
  0x61   : > { %p829_p10 = scmp.ne.s32.totalorder %s639_s16, 0 }
  0x62   : > { %vm233_vm0 = vcmask (!%p829_p10), 130048   ;;  %v597_v0 = vmov (!%p829_p10), 0.0   ;;  %s598_s10 = smov (!%p829_p10), 0.0  }
  0x63   : > { %232 = sbr.rel (%p829_p10) target bundleno = 106 (0x6a), region = 48  ;;  %234 = vst.msk [vmem:[#allocation2] sm:$0xff] (!%p829_p10), %vm233_vm0, %v597_v0  ;;  %235 = vst.msk [vmem:[#allocation2 + $0x8] sm:$0xff] (!%p829_p10), %vm233_vm0, %v597_v0  ;;  %237 = sst [smem:[#allocation10]] (!%p829_p10), %s598_s10 }
  0x6a PF: > { %v238_v1 = vld [vmem:[%s196_s30] sm:$0xff]  ;;  %v239_v4 = vld [vmem:[%s196_s30 + $0x8] sm:$0xff]  ;;  %vm250_vm1 = vcmask 130048   ;;  %p383_p13 = scmp.ne.s32.totalorder %s639_s16, 1 }
  0x6b   : > { %v240_v2 = vld [vmem:[%s205_s23] sm:$0xff]  ;;  %v241_v5 = vld [vmem:[%s205_s23 + $0x8] sm:$0xff]  ;;  %s271_s21 = sld [smem:[#allocation3]] (!%p383_p13)  ;;  %s384_s11 = sld [smem:[#allocation3 + $0x1]] (!%p383_p13) }
  0x6c   : > { %v242_v3 = vsub.f32 %v238_v1, %v240_v2  ;;  %v244_v6 = vld [vmem:[#allocation2] sm:$0xff]  ;;  %v243_v7 = vsub.f32 %v239_v4, %v241_v5  ;;  %v245_v9 = vld [vmem:[#allocation2 + $0x8] sm:$0xff]  ;;  %256 = sbr.rel (%p383_p13) target bundleno = 334 (0x14e), region = 52 }
  0x6e   : > { %v246_v8 = vmul.f32 %v242_v3, %v242_v3  ;;  %v247_v10 = vmul.f32 %v243_v7, %v243_v7 }
  0x70   : > { %v248_v11 = vadd.f32 %v246_v8, %v244_v6  ;;  %v249_v12 = vadd.f32 %v247_v10, %v245_v9 }
  0x72   : > { %251 = vst.msk [vmem:[#allocation2] sm:$0xff] %vm250_vm1, %v248_v11  ;;  %252 = vst.msk [vmem:[#allocation2 + $0x8] sm:$0xff] %vm250_vm1, %v249_v12 }
  0x79   : > { %v257_v13 = vld [vmem:[#allocation2] sm:$0xff]  ;;  %v258_v14 = vld [vmem:[#allocation2 + $0x8] sm:$0xff] }
  0x7a   : > { %v259_v15 = vsel %vm250_vm1, %v257_v13, 0.0  ;;  %v260_v16 = vsel %vm250_vm1, %v258_v14, 0.0 }
  0x7b   : > { %v261_v17 = vadd.f32 %v260_v16, %v259_v15 }
  0x7d   : > { %262 = vadd.xlane.f32.xlu0 %v261_v17 }
 0x10a   : > { %v263_v18 = vpop.xlane.xlu0 %262 }
 0x10b   : > { %v264_v19 = vrot.slane %v263_v18, 4 }
 0x10d   : > { %v265_v20 = vadd.f32 %v264_v19, %v263_v18 }
 0x10f   : > { %v266_v21 = vrot.slane %v265_v20, 2 }
 0x111   : > { %v267_v22 = vadd.f32 %v266_v21, %v265_v20 }
 0x113   : > { %v268_v23 = vrot.slane %v267_v22, 1 }
 0x115   : > { %v269_v24 = vadd.f32 %v268_v23, %v267_v22 }
 0x117   : > { %391 = vpush %v269_v24 }
 0x148   : > { %s392_s29 = spop %391 }
 0x149   : > { %s272_s4 = smul.f32 %s392_s29, %s271_s21 }
 0x14b   : > { %s274_s5 = smul.f32 %s384_s11, %s272_s4 }
 0x14d   : > { %276 = sst [smem:[#allocation10]] %s274_s5 }
 0x14e PF: > { %p419_p0 = scmp.eq.s32.totalorder %s639_s16, 1  ;;  %s532_s12 = scalar_lea.hbm %s820_s3, 16 }
 0x14f   : > { %p533_p2 = scmp.ne.s32.totalorder %s820_s3, %s532_s12  ;;  %p538_p5 = scmp.lt.u32.totalorder %s532_s12, %s820_s3 }
 0x151   : > { %p534_p3 = pnand %p533_p2, %p419_p0 }
 0x153   : > { %p535_p6 = pneg %p534_p3 }
 0x155   : > { %p540_p8 = pnand %p538_p5, %p535_p6 }
 0x157   : > { %543 = shalt.err (!%p540_p8)
}
 0x158   : > { %s599_s8 = smov [#allocation10]  }
 0x159   : > { %402 = dma.smem_to_hbm (%p419_p0), %s599_s8, 16, %s820_s3, [#allocation6]  }
 0x15a   : > { %573 = dma.done.wait (%p419_p0), [#allocation6], 16  }
 0x15b   : > { %575 = vsyncadd (%p419_p0), [#allocation6], 4294967280 }
 0x15c   : > { %290 = sfence }
 0x15d PF: > { %p18_p1 = scmp.ge.s32.totalorder %s642_s17, 4   ;;  %s830_s12 = smov %s582_s13 }
 0x15e   : > { %s831_s13 = smov %s586_s14  ;;  %s832_s14 = smov %s652_s20 }
 0x15f   : > { %s833_s15 = smov %s642_s17  ;;  %20 = sbr.rel (!%p18_p1) target bundleno = 7 (0x7), region = 97 }
 0x166   :  { %296 = vsyncpa [#allocation4], 1 }
 0x167   :  { %298 = vsyncpa [#allocation4 + $0x1], 1 }
 0x168   :  { %299 = vsyncpa [#allocation9], 1 }
 0x169   :  { %301 = vsyncpa [#allocation9 + $0x1], 1 }
 0x16a   :  { %302 = vsyncpa [#allocation5], 1 }
 0x16b   :  { %304 = vsyncpa [#allocation5 + $0x1], 1 }
 0x16c   :  { %305 = vsyncpa [#allocation6], 1 }
 0x16d   :  { %307 = vsyncpa [#allocation6 + $0x1], 1 }

</bundles_post_ra>
